<compile_context>
chip_gen: v5e
topology: v5e:2x2
jax: 0.10.0
libtpu: 0.0.40
codegen_flags: <defaults>
</compile_context>

<pallas_src>
import functools

import jax
import jax.numpy as jnp
from jax.experimental import pallas as pl
from jax.experimental.pallas import tpu as pltpu


def _autoencoder_kernel(x_ref, we_ref, wd_ref, be_ref, bd_ref, m_ref, out_ref,
                        *, CP, W, L):
    """Fused conv3x3+ReLU -> conv3x3+sigmoid for B images, lane-major layout.

    x_ref:   (C, L)      L = B*H*W lanes (B images back-to-back)
    we_ref:  (CH, 9*CP)  encoder weights, tap-major im2col matrix (bf16)
    wd_ref:  (C, 9*CP)   decoder weights, tap-major im2col matrix (bf16)
    be_ref:  (CH, 1)     encoder bias (f32)
    bd_ref:  (C, 1)      decoder bias (f32)
    m_ref:   (9, L)      per-tap border masks (f32; center row is all ones)
    out_ref: (C, L)
    """
    f32 = jnp.float32
    bf16 = jnp.bfloat16

    # Static tap offsets for a 3x3, pad=1 conv in flat (row-major) coords.
    offsets = [(kh - 1) * W + (kw - 1) for kh in range(3) for kw in range(3)]

    x2d = x_ref[...].astype(f32)          # (C, L)
    masks = m_ref[...]                    # (9, L) f32, hoisted out of the body

    def pad_rows(a):
        # Pad channel rows up to CP so im2col chunks stay sublane-tile aligned.
        c = a.shape[0]
        if c == CP:
            return a
        return jnp.concatenate([a, jnp.zeros((CP - c, L), f32)], axis=0)

    def conv3x3(act, w_ref, b_ref):
        # act: (c, L) lane-major f32; w_ref: (c_out, 9*CP) bf16; b_ref: (c_out, 1)
        act = pad_rows(act)                                    # (CP, L)
        cols = []
        for t, off in enumerate(offsets):
            if off == 0:
                cols.append(act)                               # center tap
            else:
                # out[:, p] = act[:, (p + off) % L]; wrapped / out-of-image
                # lanes are zeroed by the precomputed mask for this tap.
                v = pltpu.roll(act, (-off) % L, axis=1)        # XLU lane rotate
                cols.append(v * masks[t:t + 1, :])
        patches = jnp.concatenate(cols, axis=0).astype(bf16)   # (9*CP, L)
        return jnp.dot(w_ref[...], patches,
                       preferred_element_type=f32) + b_ref[...]  # (c_out, L)

    hid = jnp.maximum(conv3x3(x2d, we_ref, be_ref), 0.0)       # ReLU
    y = conv3x3(hid, wd_ref, bd_ref)                           # (C, L) f32
    # sigmoid(y) = 0.5 + 0.5*tanh(0.5*y): one EUP op, exact (no approx recip).
    out_ref[...] = (0.5 + 0.5 * jnp.tanh(0.5 * y)).astype(out_ref.dtype)


def _pack_conv_weights(w_hwio, cp):
    """(3,3,Cin,Cout) HWIO -> (Cout, 9*cp) tap-major bf16 matrix, Cin padded."""
    _, _, cin, cout = w_hwio.shape
    w = jnp.transpose(w_hwio, (3, 0, 1, 2)).reshape(cout, 9, cin)
    if cin < cp:
        w = jnp.pad(w, ((0, 0), (0, 0), (0, cp - cin)))
    return w.reshape(cout, 9 * cp).astype(jnp.bfloat16)


def _make_tap_masks(H, W, B):
    """(9, B*H*W) f32 border-validity masks; center tap row is all ones."""
    HW = H * W
    pos = jnp.arange(HW, dtype=jnp.int32)
    hh = pos // W
    ww = pos % W
    rows = []
    for kh in range(3):
        for kw in range(3):
            dh, dw = kh - 1, kw - 1
            valid = ((hh + dh >= 0) & (hh + dh < H) &
                     (ww + dw >= 0) & (ww + dw < W))
            rows.append(valid.astype(jnp.float32))
    m = jnp.stack(rows, axis=0)                       # (9, HW)
    return jnp.tile(m, (1, B))                        # (9, B*HW)


def _choose_images_per_step(n, target=32):
    """Largest divisor of n that is <= target and keeps >= 2 grid steps."""
    best = 1
    for b in range(1, min(n, target) + 1):
        if n % b == 0 and (n // b >= 2 or n == 1):
            best = b
    return best


def fast_autoencoder(x_nchw, params):
    """Forward pass decoder(encoder(x)); input/output NCHW like PyTorch."""
    N, C, H, W = x_nchw.shape
    CH = params["w_enc"].shape[-1]
    HW = H * W
    CP = -(-max(C, CH) // 8) * 8          # channel rows rounded to sublane tile
    B = _choose_images_per_step(N)        # images per grid step (lane batching)
    L = B * HW                            # lanes per block
    G = N // B                            # grid steps (>=2 when N>=2: megacore)

    we2d = _pack_conv_weights(params["w_enc"], CP)            # (CH, 9*CP) bf16
    wd2d = _pack_conv_weights(params["w_dec"], CP)            # (C,  9*CP) bf16
    be = params["b_enc"].reshape(CH, 1).astype(jnp.float32)
    bd = params["b_dec"].reshape(C, 1).astype(jnp.float32)
    masks = _make_tap_masks(H, W, B)                          # (9, L) f32

    # One cheap transpose of a small array: NCHW -> (C, N*HW) lane-major slab.
    x_lane = jnp.transpose(x_nchw.reshape(N, C, HW), (1, 0, 2)).reshape(C, N * HW)

    kernel = functools.partial(_autoencoder_kernel, CP=CP, W=W, L=L)

    itemsize = jnp.dtype(x_nchw.dtype).itemsize
    cost = pl.CostEstimate(
        flops=2 * N * HW * 9 * CP * (CH + C),
        transcendentals=N * HW * C,                           # sigmoid tanh
        bytes_accessed=(2 * N * C * HW + masks.size) * itemsize
                       + 2 * (we2d.size + wd2d.size) + 4 * (be.size + bd.size),
    )

    out = pl.pallas_call(
        kernel,
        out_shape=jax.ShapeDtypeStruct((C, N * HW), x_nchw.dtype),
        grid=(G,),                                            # B images / step
        in_specs=[
            pl.BlockSpec((C, L), lambda g: (0, g)),           # x slab
            pl.BlockSpec((CH, 9 * CP), lambda g: (0, 0)),     # enc weights
            pl.BlockSpec((C, 9 * CP), lambda g: (0, 0)),      # dec weights
            pl.BlockSpec((CH, 1), lambda g: (0, 0)),          # enc bias
            pl.BlockSpec((C, 1), lambda g: (0, 0)),           # dec bias
            pl.BlockSpec((9, L), lambda g: (0, 0)),           # border masks
        ],
        out_specs=pl.BlockSpec((C, L), lambda g: (0, g)),
        compiler_params=pltpu.CompilerParams(
            dimension_semantics=("parallel",)),
        cost_estimate=cost,
    )(x_lane, we2d, wd2d, be, bd, masks)

    # (C, N*HW) -> NCHW
    return jnp.transpose(out.reshape(C, N, HW), (1, 0, 2)).reshape(N, C, H, W)


def init_params(key, c_in, c_hid):
    k1, k2, k3, k4 = jax.random.split(key, 4)
    # deterministic synthetic weights (HWIO layout)
    return {
        "w_enc": 0.1 * jax.random.normal(k1, (3, 3, c_in, c_hid), jnp.float32),
        "b_enc": 0.1 * jax.random.normal(k2, (c_hid,), jnp.float32),
        "w_dec": 0.1 * jax.random.normal(k3, (3, 3, c_hid, c_in), jnp.float32),
        "b_dec": 0.1 * jax.random.normal(k4, (c_in,), jnp.float32),
    }


def _reference(x_nchw, params):
    """Pure-JAX reference (lax.conv, f32) matching PyTorch NCHW conv semantics."""
    def conv(x, w_hwio, b, act):
        w_oihw = jnp.transpose(w_hwio, (3, 2, 0, 1))          # OIHW for NCHW
        y = jax.lax.conv_general_dilated(
            x, w_oihw, window_strides=(1, 1), padding="SAME",
            dimension_numbers=("NCHW", "OIHW", "NCHW"))
        y = y + b[None, :, None, None]
        return jnp.maximum(y, 0.0) if act == "relu" else jax.nn.sigmoid(y)

    h = conv(x_nchw, params["w_enc"], params["b_enc"], "relu")
    return conv(h, params["w_dec"], params["b_dec"], "sigmoid")


if __name__ == "__main__":
    key = jax.random.PRNGKey(0)
    k_x, k_p = jax.random.split(key)

    N, C, H, W = 2, 4, 16, 16       # small NCHW input, PyTorch convention
    C_HID = 8
    x = jax.random.normal(k_x, (N, C, H, W), jnp.float32)
    params = init_params(k_p, C, C_HID)

    fwd = jax.jit(fast_autoencoder)
    out = jax.block_until_ready(fwd(x, params))

    ref = jax.block_until_ready(_reference(x, params))
    assert out.shape == (N, C, H, W)
    # Tolerance budget: matmuls use bf16 MXU operands with f32 accumulation
    # (~1e-3 worst-case post-sigmoid); sigmoid itself is exact (tanh form).
    err = float(jnp.max(jnp.abs(out - ref)))
    assert jnp.allclose(out, ref, atol=5e-3, rtol=5e-3), err

    print("KERNEL_OK")
</pallas_src>

<mosaic_0001>
module attributes {stable_mosaic.version = 11 : i64} {
  func.func @_autoencoder_kernel(%arg0: i32, %arg1: memref<4x256xf32, #tpu.memory_space<vmem>>, %arg2: memref<8x72xbf16, #tpu.memory_space<vmem>>, %arg3: memref<4x72xbf16, #tpu.memory_space<vmem>>, %arg4: memref<8x1xf32, #tpu.memory_space<vmem>>, %arg5: memref<4x1xf32, #tpu.memory_space<vmem>>, %arg6: memref<9x256xf32, #tpu.memory_space<vmem>>, %arg7: memref<4x256xf32, #tpu.memory_space<vmem>>) attributes {dimension_semantics = [#tpu.dimension_semantics<parallel>], iteration_bounds = array<i64: 2>, scalar_prefetch = 0 : i64, scratch_operands = 0 : i64, tpu.core_type = #tpu.core_type<tc>, window_params = [{transform_indices = @transform_0, window_bounds = array<i64: 4, 256>}, {pipeline_mode = #tpu.pipeline_mode<synchronous>, transform_indices = @transform_1, window_bounds = array<i64: 8, 72>}, {pipeline_mode = #tpu.pipeline_mode<synchronous>, transform_indices = @transform_2, window_bounds = array<i64: 4, 72>}, {pipeline_mode = #tpu.pipeline_mode<synchronous>, transform_indices = @transform_3, window_bounds = array<i64: 8, 1>}, {pipeline_mode = #tpu.pipeline_mode<synchronous>, transform_indices = @transform_4, window_bounds = array<i64: 4, 1>}, {pipeline_mode = #tpu.pipeline_mode<synchronous>, transform_indices = @transform_5, window_bounds = array<i64: 9, 256>}, {transform_indices = @transform_6, window_bounds = array<i64: 4, 256>}]} {
    %c0 = arith.constant 0 : index
    %c0_0 = arith.constant 0 : index
    %0 = vector.load %arg1[%c0, %c0_0] : memref<4x256xf32, #tpu.memory_space<vmem>>, vector<4x256xf32>
    %c0_1 = arith.constant 0 : index
    %c0_2 = arith.constant 0 : index
    %1 = vector.load %arg6[%c0_1, %c0_2] : memref<9x256xf32, #tpu.memory_space<vmem>>, vector<9x256xf32>
    %cst = arith.constant 0.000000e+00 : f32
    %2 = vector.broadcast %cst : f32 to vector<4x256xf32>
    %3 = tpu.concatenate %0, %2 in 0 : vector<4x256xf32>, vector<4x256xf32> -> vector<8x256xf32>
    %c17_i32 = arith.constant 17 : i32
    %4 = tpu.dynamic_rotate %3 by %c17_i32 dim 1 : vector<8x256xf32>, i32 -> vector<8x256xf32>
    %5 = vector.extract_strided_slice %1 {offsets = [0, 0], sizes = [1, 256], strides = [1, 1]} : vector<9x256xf32> to vector<1x256xf32>
    %6 = vector.broadcast %5 : vector<1x256xf32> to vector<8x256xf32>
    %7 = arith.mulf %4, %6 : vector<8x256xf32>
    %c16_i32 = arith.constant 16 : i32
    %8 = tpu.dynamic_rotate %3 by %c16_i32 dim 1 : vector<8x256xf32>, i32 -> vector<8x256xf32>
    %9 = vector.extract_strided_slice %1 {offsets = [1, 0], sizes = [1, 256], strides = [1, 1]} : vector<9x256xf32> to vector<1x256xf32>
    %10 = vector.broadcast %9 : vector<1x256xf32> to vector<8x256xf32>
    %11 = arith.mulf %8, %10 : vector<8x256xf32>
    %c15_i32 = arith.constant 15 : i32
    %12 = tpu.dynamic_rotate %3 by %c15_i32 dim 1 : vector<8x256xf32>, i32 -> vector<8x256xf32>
    %13 = vector.extract_strided_slice %1 {offsets = [2, 0], sizes = [1, 256], strides = [1, 1]} : vector<9x256xf32> to vector<1x256xf32>
    %14 = vector.broadcast %13 : vector<1x256xf32> to vector<8x256xf32>
    %15 = arith.mulf %12, %14 : vector<8x256xf32>
    %c1_i32 = arith.constant 1 : i32
    %16 = tpu.dynamic_rotate %3 by %c1_i32 dim 1 : vector<8x256xf32>, i32 -> vector<8x256xf32>
    %17 = vector.extract_strided_slice %1 {offsets = [3, 0], sizes = [1, 256], strides = [1, 1]} : vector<9x256xf32> to vector<1x256xf32>
    %18 = vector.broadcast %17 : vector<1x256xf32> to vector<8x256xf32>
    %19 = arith.mulf %16, %18 : vector<8x256xf32>
    %c255_i32 = arith.constant 255 : i32
    %20 = tpu.dynamic_rotate %3 by %c255_i32 dim 1 : vector<8x256xf32>, i32 -> vector<8x256xf32>
    %21 = vector.extract_strided_slice %1 {offsets = [5, 0], sizes = [1, 256], strides = [1, 1]} : vector<9x256xf32> to vector<1x256xf32>
    %22 = vector.broadcast %21 : vector<1x256xf32> to vector<8x256xf32>
    %23 = arith.mulf %20, %22 : vector<8x256xf32>
    %c241_i32 = arith.constant 241 : i32
    %24 = tpu.dynamic_rotate %3 by %c241_i32 dim 1 : vector<8x256xf32>, i32 -> vector<8x256xf32>
    %25 = vector.extract_strided_slice %1 {offsets = [6, 0], sizes = [1, 256], strides = [1, 1]} : vector<9x256xf32> to vector<1x256xf32>
    %26 = vector.broadcast %25 : vector<1x256xf32> to vector<8x256xf32>
    %27 = arith.mulf %24, %26 : vector<8x256xf32>
    %c240_i32 = arith.constant 240 : i32
    %28 = tpu.dynamic_rotate %3 by %c240_i32 dim 1 : vector<8x256xf32>, i32 -> vector<8x256xf32>
    %29 = vector.extract_strided_slice %1 {offsets = [7, 0], sizes = [1, 256], strides = [1, 1]} : vector<9x256xf32> to vector<1x256xf32>
    %30 = vector.broadcast %29 : vector<1x256xf32> to vector<8x256xf32>
    %31 = arith.mulf %28, %30 : vector<8x256xf32>
    %c239_i32 = arith.constant 239 : i32
    %32 = tpu.dynamic_rotate %3 by %c239_i32 dim 1 : vector<8x256xf32>, i32 -> vector<8x256xf32>
    %33 = vector.extract_strided_slice %1 {offsets = [8, 0], sizes = [1, 256], strides = [1, 1]} : vector<9x256xf32> to vector<1x256xf32>
    %34 = vector.broadcast %33 : vector<1x256xf32> to vector<8x256xf32>
    %35 = arith.mulf %32, %34 : vector<8x256xf32>
    %36 = tpu.concatenate %7, %11, %15, %19, %3, %23, %27, %31, %35 in 0 : vector<8x256xf32>, vector<8x256xf32>, vector<8x256xf32>, vector<8x256xf32>, vector<8x256xf32>, vector<8x256xf32>, vector<8x256xf32>, vector<8x256xf32>, vector<8x256xf32> -> vector<72x256xf32>
    %37 = arith.truncf %36 : vector<72x256xf32> to vector<72x256xbf16>
    %c0_3 = arith.constant 0 : index
    %c0_4 = arith.constant 0 : index
    %38 = vector.load %arg2[%c0_3, %c0_4] : memref<8x72xbf16, #tpu.memory_space<vmem>>, vector<8x72xbf16>
    %cst_5 = arith.constant dense<0.000000e+00> : vector<8x256xf32>
    %39 = tpu.matmul %38, %37, %cst_5 {dimension_numbers = #tpu.dot_dimension_numbers<[1], [0], [0], [1], [0, 0, 1, 1], [], []>} : vector<8x72xbf16>, vector<72x256xbf16>, vector<8x256xf32> -> vector<8x256xf32>
    %c0_6 = arith.constant 0 : index
    %c0_7 = arith.constant 0 : index
    %40 = vector.load %arg4[%c0_6, %c0_7] : memref<8x1xf32, #tpu.memory_space<vmem>>, vector<8x1xf32>
    %41 = vector.broadcast %40 : vector<8x1xf32> to vector<8x256xf32>
    %42 = arith.addf %39, %41 : vector<8x256xf32>
    %cst_8 = arith.constant 0.000000e+00 : f32
    %43 = vector.broadcast %cst_8 : f32 to vector<8x256xf32>
    %44 = arith.maximumf %42, %43 : vector<8x256xf32>
    %c17_i32_9 = arith.constant 17 : i32
    %45 = tpu.dynamic_rotate %44 by %c17_i32_9 dim 1 : vector<8x256xf32>, i32 -> vector<8x256xf32>
    %46 = vector.extract_strided_slice %1 {offsets = [0, 0], sizes = [1, 256], strides = [1, 1]} : vector<9x256xf32> to vector<1x256xf32>
    %47 = vector.broadcast %46 : vector<1x256xf32> to vector<8x256xf32>
    %48 = arith.mulf %45, %47 : vector<8x256xf32>
    %c16_i32_10 = arith.constant 16 : i32
    %49 = tpu.dynamic_rotate %44 by %c16_i32_10 dim 1 : vector<8x256xf32>, i32 -> vector<8x256xf32>
    %50 = vector.extract_strided_slice %1 {offsets = [1, 0], sizes = [1, 256], strides = [1, 1]} : vector<9x256xf32> to vector<1x256xf32>
    %51 = vector.broadcast %50 : vector<1x256xf32> to vector<8x256xf32>
    %52 = arith.mulf %49, %51 : vector<8x256xf32>
    %c15_i32_11 = arith.constant 15 : i32
    %53 = tpu.dynamic_rotate %44 by %c15_i32_11 dim 1 : vector<8x256xf32>, i32 -> vector<8x256xf32>
    %54 = vector.extract_strided_slice %1 {offsets = [2, 0], sizes = [1, 256], strides = [1, 1]} : vector<9x256xf32> to vector<1x256xf32>
    %55 = vector.broadcast %54 : vector<1x256xf32> to vector<8x256xf32>
    %56 = arith.mulf %53, %55 : vector<8x256xf32>
    %c1_i32_12 = arith.constant 1 : i32
    %57 = tpu.dynamic_rotate %44 by %c1_i32_12 dim 1 : vector<8x256xf32>, i32 -> vector<8x256xf32>
    %58 = vector.extract_strided_slice %1 {offsets = [3, 0], sizes = [1, 256], strides = [1, 1]} : vector<9x256xf32> to vector<1x256xf32>
    %59 = vector.broadcast %58 : vector<1x256xf32> to vector<8x256xf32>
    %60 = arith.mulf %57, %59 : vector<8x256xf32>
    %c255_i32_13 = arith.constant 255 : i32
    %61 = tpu.dynamic_rotate %44 by %c255_i32_13 dim 1 : vector<8x256xf32>, i32 -> vector<8x256xf32>
    %62 = vector.extract_strided_slice %1 {offsets = [5, 0], sizes = [1, 256], strides = [1, 1]} : vector<9x256xf32> to vector<1x256xf32>
    %63 = vector.broadcast %62 : vector<1x256xf32> to vector<8x256xf32>
    %64 = arith.mulf %61, %63 : vector<8x256xf32>
    %c241_i32_14 = arith.constant 241 : i32
    %65 = tpu.dynamic_rotate %44 by %c241_i32_14 dim 1 : vector<8x256xf32>, i32 -> vector<8x256xf32>
    %66 = vector.extract_strided_slice %1 {offsets = [6, 0], sizes = [1, 256], strides = [1, 1]} : vector<9x256xf32> to vector<1x256xf32>
    %67 = vector.broadcast %66 : vector<1x256xf32> to vector<8x256xf32>
    %68 = arith.mulf %65, %67 : vector<8x256xf32>
    %c240_i32_15 = arith.constant 240 : i32
    %69 = tpu.dynamic_rotate %44 by %c240_i32_15 dim 1 : vector<8x256xf32>, i32 -> vector<8x256xf32>
    %70 = vector.extract_strided_slice %1 {offsets = [7, 0], sizes = [1, 256], strides = [1, 1]} : vector<9x256xf32> to vector<1x256xf32>
    %71 = vector.broadcast %70 : vector<1x256xf32> to vector<8x256xf32>
    %72 = arith.mulf %69, %71 : vector<8x256xf32>
    %c239_i32_16 = arith.constant 239 : i32
    %73 = tpu.dynamic_rotate %44 by %c239_i32_16 dim 1 : vector<8x256xf32>, i32 -> vector<8x256xf32>
    %74 = vector.extract_strided_slice %1 {offsets = [8, 0], sizes = [1, 256], strides = [1, 1]} : vector<9x256xf32> to vector<1x256xf32>
    %75 = vector.broadcast %74 : vector<1x256xf32> to vector<8x256xf32>
    %76 = arith.mulf %73, %75 : vector<8x256xf32>
    %77 = tpu.concatenate %48, %52, %56, %60, %44, %64, %68, %72, %76 in 0 : vector<8x256xf32>, vector<8x256xf32>, vector<8x256xf32>, vector<8x256xf32>, vector<8x256xf32>, vector<8x256xf32>, vector<8x256xf32>, vector<8x256xf32>, vector<8x256xf32> -> vector<72x256xf32>
    %78 = arith.truncf %77 : vector<72x256xf32> to vector<72x256xbf16>
    %c0_17 = arith.constant 0 : index
    %c0_18 = arith.constant 0 : index
    %79 = vector.load %arg3[%c0_17, %c0_18] : memref<4x72xbf16, #tpu.memory_space<vmem>>, vector<4x72xbf16>
    %cst_19 = arith.constant dense<0.000000e+00> : vector<4x256xf32>
    %80 = tpu.matmul %79, %78, %cst_19 {dimension_numbers = #tpu.dot_dimension_numbers<[1], [0], [0], [1], [0, 0, 1, 1], [], []>} : vector<4x72xbf16>, vector<72x256xbf16>, vector<4x256xf32> -> vector<4x256xf32>
    %c0_20 = arith.constant 0 : index
    %c0_21 = arith.constant 0 : index
    %81 = vector.load %arg5[%c0_20, %c0_21] : memref<4x1xf32, #tpu.memory_space<vmem>>, vector<4x1xf32>
    %82 = vector.broadcast %81 : vector<4x1xf32> to vector<4x256xf32>
    %83 = arith.addf %80, %82 : vector<4x256xf32>
    %cst_22 = arith.constant 5.000000e-01 : f32
    %84 = vector.broadcast %cst_22 : f32 to vector<4x256xf32>
    %85 = arith.mulf %84, %83 : vector<4x256xf32>
    %86 = math.tanh %85 : vector<4x256xf32>
    %cst_23 = arith.constant 5.000000e-01 : f32
    %87 = vector.broadcast %cst_23 : f32 to vector<4x256xf32>
    %88 = arith.mulf %87, %86 : vector<4x256xf32>
    %cst_24 = arith.constant 5.000000e-01 : f32
    %89 = vector.broadcast %cst_24 : f32 to vector<4x256xf32>
    %90 = arith.addf %89, %88 : vector<4x256xf32>
    %c0_25 = arith.constant 0 : index
    %c0_26 = arith.constant 0 : index
    %91 = vector.load %arg7[%c0_25, %c0_26] : memref<4x256xf32, #tpu.memory_space<vmem>>, vector<4x256xf32>
    tpu.vector_store %arg7[%c0_25, %c0_26], %90 {strides = array<i32>} : memref<4x256xf32, #tpu.memory_space<vmem>>, vector<4x256xf32>,
    return
  }
  func.func @transform_0(%arg0: i32) -> (i32, i32) {
    %c0_i32 = arith.constant 0 : i32
    %c0_i32_0 = arith.constant 0 : i32
    return %c0_i32, %arg0 : i32, i32
  }
  func.func @transform_1(%arg0: i32) -> (i32, i32) {
    %c0_i32 = arith.constant 0 : i32
    %c0_i32_0 = arith.constant 0 : i32
    %c0_i32_1 = arith.constant 0 : i32
    return %c0_i32, %c0_i32_0 : i32, i32
  }
  func.func @transform_2(%arg0: i32) -> (i32, i32) {
    %c0_i32 = arith.constant 0 : i32
    %c0_i32_0 = arith.constant 0 : i32
    %c0_i32_1 = arith.constant 0 : i32
    return %c0_i32, %c0_i32_0 : i32, i32
  }
  func.func @transform_3(%arg0: i32) -> (i32, i32) {
    %c0_i32 = arith.constant 0 : i32
    %c0_i32_0 = arith.constant 0 : i32
    %c0_i32_1 = arith.constant 0 : i32
    return %c0_i32, %c0_i32_0 : i32, i32
  }
  func.func @transform_4(%arg0: i32) -> (i32, i32) {
    %c0_i32 = arith.constant 0 : i32
    %c0_i32_0 = arith.constant 0 : i32
    %c0_i32_1 = arith.constant 0 : i32
    return %c0_i32, %c0_i32_0 : i32, i32
  }
  func.func @transform_5(%arg0: i32) -> (i32, i32) {
    %c0_i32 = arith.constant 0 : i32
    %c0_i32_0 = arith.constant 0 : i32
    %c0_i32_1 = arith.constant 0 : i32
    return %c0_i32, %c0_i32_0 : i32, i32
  }
  func.func @transform_6(%arg0: i32) -> (i32, i32) {
    %c0_i32 = arith.constant 0 : i32
    %c0_i32_0 = arith.constant 0 : i32
    return %c0_i32, %arg0 : i32, i32
  }
}

</mosaic_0001>

<bundles_post_ra>
// kernel: fast_autoencoder.1
= control target key start
LH: loop header
LB: loop body
LE: loop exit
PB: predicated region body
PF: predicated region fallthrough
CT: control target
= control target key end

     0   :  { %s701_s21 = smov 0   ;;  %s957_s0 = inlined_call_operand.vmem [shape: f32[4,512], index: 0, kind: input, shape index: {}]   ;;  %s958_s1 = inlined_call_operand.vmem [shape: bf16[8,72], index: 1, kind: input, shape index: {}]   ;;  %s959_s2 = inlined_call_operand.vmem [shape: bf16[4,72], index: 2, kind: input, shape index: {}]   ;;  %s960_s3 = inlined_call_operand.vmem [shape: f32[8,1], index: 3, kind: input, shape index: {}]   ;;  %s961_s4 = inlined_call_operand.vmem [shape: f32[4,1], index: 4, kind: input, shape index: {}]   ;;  %s962_s5 = inlined_call_operand.vmem [shape: f32[9,256], index: 5, kind: input, shape index: {}]   ;;  %s963_s6 = inlined_call_operand.vmem [shape: f32[4,512], index: 6, kind: output, shape index: {}]  }
   0x1 LB: > { %s601_s22 = sadd.s32 4294967295, %s654_s21   ;;  %p605_p0 = scmp.ge.s32.totalorder %s654_s21, 1  ;;  %s654_s21 = sphi %s701_s21, %s16_s21  }
   0x2   : > { %p213_p1 = scmp.lt.s32.totalorder %s654_s21, 3 }
   0x4   : > { %p214_p2 = pnand %p605_p0, %p213_p1 }
   0x5   : > { %s606_s23 = sshll.u32 (!%p214_p2), %s601_s22, 1  ;;  %s656_s28 = smov (!%p214_p2), 113  }
   0x6   : > { %217 = sbr.rel (%p214_p2) target bundleno = 625 (0x271), region = 44  ;;  %p244_p3 = scmp.lt.s32.totalorder (!%p214_p2), %s606_s23, 3 }
   0x7   : > { %s657_s29 = smov (!%p214_p2), 111   ;;  %s658_s30 = smov (!%p214_p2), 112  }
   0x8   : > { %s659_s7 = smov (!%p214_p2), 127   ;;  %s660_s8 = smov (!%p214_p2), 15  }
   0x9   : > { %s661_s9 = smov (!%p214_p2), 1   ;;  %s662_s10 = smov (!%p214_p2), 17  }
   0xa   : > { %s663_s11 = smov (!%p214_p2), 16  }
   0xb   : > { %s965_s23 = smov (!%p244_p3, %s606_s23), 3  ;;  %vm267_vm0 = vcmask 1043456   ;;  %v274_v6 = vlaneseq  ;;  %v746_v11 = vld [vmem:[%s962_s5] sm:$0xff]  ;;  %v751_v12 = vld [vmem:[%s962_s5 + $0x8] sm:$0xff]  ;;  %v759_v13 = vld [vmem:[%s962_s5 + $0x10] ss:$0 sm:$0xff] }
   0xc   : > { %s607_s24 = sshll.u32 %s965_s23, 2  ;;  %v764_v14 = vld [vmem:[%s962_s5 + $0x18] ss:$0 sm:$0xff]  ;;  %v345_v15 = vperm.slane %v746_v11, 7  ;;  %v346_v16 = vperm.slane %v751_v12, 7  ;;  %v334_v17 = vperm.slane %v746_v11, 6 }
   0xd   : > { %s247_s27 = scalar_lea.vmem %s957_s0, %s607_s24  ;;  %v741_v9 = vand.u32 127, %v274_v6  ;;  %v335_v18 = vperm.slane %v751_v12, 6  ;;  %v323_v38 = vperm.slane %v746_v11, 5  ;;  %v324_v39 = vperm.slane %v751_v12, 5  ;;  %v371_v46 = vld [vmem:[%s960_s3] sm:$0xff] }
   0xe   : > { %v256_v0 = vld [vmem:[%s247_s27] sm:$0xff]  ;;  %v664_v49 = vmov 0   ;;  %vm665_vm5 = vmmov 1   ;;  %v312_v52 = vperm.slane %v746_v11, 3  ;;  %v313_v54 = vperm.slane %v751_v12, 3 }
   0xf   : > { %262 = vst [vmem:[#allocation1] ss:$2 sm:$0xff] %v256_v0  ;;  %vm342_vm1 = vcmp.lt.s32.totalorder %v741_v9, 112  ;;  %vm331_vm2 = vcmp.lt.s32.totalorder %v741_v9, 113  ;;  %vm353_vm3 = vcmp.lt.s32.totalorder %v741_v9, 111  ;;  %vm320_vm4 = vcmp.lt.s32.totalorder %v741_v9, 127  ;;  %640 = vset.pattern.permute.xlu1 %v664_v49  ;;  %641 = vset.pattern.permute.xlu0 %v664_v49  ;;  %vm610_vm6 = vmpackc.low %vm665_vm5, %vm267_vm0 }
  0x10   : > { %vm309_vm7 = vcmp.lt.s32.totalorder %v741_v9, 1  ;;  %vm298_vm8 = vcmp.lt.s32.totalorder %v741_v9, 15  ;;  %v301_v55 = vperm.slane %v746_v11, 2  ;;  %v302_v56 = vperm.slane %v751_v12, 2 }
  0x11   : > { %vm276_vm9 = vcmp.lt.s32.totalorder %v741_v9, 17  ;;  %vm287_vm10 = vcmp.lt.s32.totalorder %v741_v9, 16  ;;  %vm377_vm11 = vcmask 588800  }
  0x16   : > { %v717_v1 = vld.sshfl [vmem:[#allocation1] sm:$0xff pattern:$0x75316420]  ;;  %v724_v3 = vld.sshfl [vmem:[#allocation1 + $0x8] sm:$0xff pattern:$0x75316420] }
  0x17   : > { %v268_v2 = vsel %vm267_vm0, %v717_v1, 0.0  ;;  %v269_v4 = vsel %vm267_vm0, %v724_v3, 0.0 }
  0x18   : > { %327 = vrot.lane.b32.xlu1 %v268_v2, %s656_s28  ;;  %349 = vrot.lane.b32.xlu0 %v268_v2, %s657_s29 }
  0x19   : > { %338 = vrot.lane.b32.xlu2 %v268_v2, %s658_s30 }
  0x20   : > { %329 = vrot.lane.b32.xlu1 %v269_v4, %s656_s28  ;;  %351 = vrot.lane.b32.xlu0 %v269_v4, %s657_s29 }
  0x21   : > { %340 = vrot.lane.b32.xlu2 %v269_v4, %s658_s30 }
  0x28   : > { %318 = vrot.lane.b32.xlu1 %v269_v4, %s659_s7  ;;  %316 = vrot.lane.b32.xlu0 %v268_v2, %s659_s7 }
  0x29   : > { %294 = vrot.lane.b32.xlu2 %v268_v2, %s660_s8 }
  0x30   : > { %305 = vrot.lane.b32.xlu1 %v268_v2, %s661_s9  ;;  %296 = vrot.lane.b32.xlu0 %v269_v4, %s660_s8 }
  0x31   : > { %307 = vrot.lane.b32.xlu2 %v269_v4, %s661_s9 }
  0x38   : > { %272 = vrot.lane.b32.xlu1 %v269_v4, %s662_s10  ;;  %270 = vrot.lane.b32.xlu0 %v268_v2, %s662_s10 }
  0x39   : > { %283 = vrot.lane.b32.xlu2 %v268_v2, %s663_s11 }
  0x40   : > { %285 = vrot.lane.b32.xlu0 %v269_v4, %s663_s11  ;;  %374 = vperm.xlu1 %640, %v371_v46  }
  0x73   : > { %v339_v5 = vpop.permute.xlu2 %338 }
  0x7b   : > { %v341_v10 = vpop.permute.xlu2 %340 }
  0x7c   : > { %v343_v21 = vsel %vm342_vm1, %v339_v5, %v341_v10  ;;  %v344_v25 = vsel %vm342_vm1, %v341_v10, %v339_v5 }
  0x7d   : > { %v347_v29 = vmul.f32 %v345_v15, %v343_v21  ;;  %v348_v34 = vmul.f32 %v346_v16, %v344_v25 }
  0x83   : > { %v295_v33 = vpop.permute.xlu2 %294 }
  0x8a   : > { %v328_v7 = vpop.permute.xlu1 %327  ;;  %v350_v8 = vpop.permute.xlu0 %349 }
  0x8b   : > { %v308_v53 = vpop.permute.xlu2 %307 }
  0x92   : > { %v330_v19 = vpop.permute.xlu1 %329  ;;  %v352_v20 = vpop.permute.xlu0 %351 }
  0x93   : > { %v332_v22 = vsel %vm331_vm2, %v328_v7, %v330_v19  ;;  %v354_v23 = vsel %vm353_vm3, %v350_v8, %v352_v20  ;;  %v355_v24 = vsel %vm353_vm3, %v352_v20, %v350_v8  ;;  %v333_v26 = vsel %vm331_vm2, %v330_v19, %v328_v7  ;;  %v284_v10 = vpop.permute.xlu2 %283 }
  0x94   : > { %v358_v27 = vmul.f32 %v759_v13, %v354_v23  ;;  %v359_v28 = vmul.f32 %v764_v14, %v355_v24  ;;  %v336_v30 = vmul.f32 %v334_v17, %v332_v22  ;;  %v337_v35 = vmul.f32 %v335_v18, %v333_v26 }
  0x95   : > { %v279_v7 = vperm.slane %v746_v11, 0  ;;  %v280_v8 = vperm.slane %v751_v12, 0  ;;  %v290_v19 = vperm.slane %v746_v11, 1  ;;  %v291_v20 = vperm.slane %v751_v12, 1 }
  0x96   : > { %v368_v31 = vpack.c.bf16 %v358_v27, %v358_v27  ;;  %v369_v32 = vpack.c.bf16 %v359_v28, %v359_v28  ;;  %v366_v42 = vpack.c.bf16 %v347_v29, %v336_v30  ;;  %v367_v45 = vpack.c.bf16 %v348_v34, %v337_v35 }
  0x98   : > { %v382_v36 = vsel %vm267_vm0, %v368_v31, 0  ;;  %v385_v37 = vsel %vm267_vm0, %v369_v32, 0  ;;  %v370_v32 = vld [vmem:[%s958_s1] sm:$0xf] }
  0x99   : > { %390 = vmatpush.bf16.msra.mxu0 %v382_v36  ;;  %403 = vmatpush.bf16.msra.mxu1 %v385_v37 }
  0x9a   : > { %v319_v40 = vpop.permute.xlu1 %318  ;;  %v317_v41 = vpop.permute.xlu0 %316 }
  0x9b   : > { %v321_v43 = vsel %vm320_vm4, %v317_v41, %v319_v40  ;;  %v322_v44 = vsel %vm320_vm4, %v319_v40, %v317_v41 }
  0x9c   : > { %v325_v47 = vmul.f32 %v323_v38, %v321_v43  ;;  %v326_v48 = vmul.f32 %v324_v39, %v322_v44 }
  0x9d   : > { %391 = vmatpush.bf16.msra.mxu0 %v366_v42  ;;  %404 = vmatpush.bf16.msra.mxu1 %v367_v45 }
  0x9e   : > { %v611_v50 = vpack.c.bf16 %v325_v47, %v717_v1  ;;  %v615_v51 = vpack.c.bf16 %v326_v48, %v724_v3 }
  0xa1   : > { %612 = vmatpush.bf16.msk.msra.mxu0 %vm610_vm6, %v611_v50  ;;  %616 = vmatpush.bf16.msk.msra.mxu1 %vm610_vm6, %v615_v51 }
  0xa2   : > { %v306_v57 = vpop.permute.xlu1 %305  ;;  %v297_v58 = vpop.permute.xlu0 %296 }
  0xa3   : > { %v310_v59 = vsel %vm309_vm7, %v306_v57, %v308_v53  ;;  %v311_v60 = vsel %vm309_vm7, %v308_v53, %v306_v57  ;;  %v299_v61 = vsel %vm298_vm8, %v295_v33, %v297_v58  ;;  %v300_v62 = vsel %vm298_vm8, %v297_v58, %v295_v33 }
  0xa4   : > { %v314_v63 = vmul.f32 %v312_v52, %v311_v60  ;;  %v315_v0 = vmul.f32 %v313_v54, %v310_v59  ;;  %v303_v1 = vmul.f32 %v301_v55, %v300_v62  ;;  %v304_v2 = vmul.f32 %v302_v56, %v299_v61 }
  0xa6   : > { %v362_v3 = vpack.c.bf16 %v314_v63, %v303_v1  ;;  %v363_v4 = vpack.c.bf16 %v315_v0, %v304_v2  ;;  %v490_v1 = vld [vmem:[%s961_s4] sm:$0xf] }
  0xa8   : > { %393 = vmatpush.bf16.msra.mxu0 %v362_v3  ;;  %406 = vmatpush.bf16.msra.mxu1 %v363_v4 }
  0xaa   : > { %v271_v5 = vpop.permute.xlu0 %270  ;;  %v273_v6 = vpop.permute.xlu1 %272 }
  0xab   : > { %v277_v21 = vsel %vm276_vm9, %v271_v5, %v273_v6  ;;  %v278_v22 = vsel %vm276_vm9, %v273_v6, %v271_v5 }
  0xac   : > { %v281_v26 = vmul.f32 %v279_v7, %v278_v22  ;;  %v282_v27 = vmul.f32 %v280_v8, %v277_v21 }
  0xb2   : > { %v286_v23 = vpop.permute.xlu0 %285  ;;  %v375_v33 = vpop.permute.xlu1 %374 }
  0xb3   : > { %v288_v24 = vsel %vm287_vm10, %v284_v10, %v286_v23  ;;  %v289_v25 = vsel %vm287_vm10, %v286_v23, %v284_v10 }
  0xb4   : > { %v292_v28 = vmul.f32 %v290_v19, %v289_v25  ;;  %v293_v29 = vmul.f32 %v291_v20, %v288_v24 }
  0xb6   : > { %v360_v30 = vpack.c.bf16 %v292_v28, %v281_v26  ;;  %v361_v31 = vpack.c.bf16 %v293_v29, %v282_v27 }
  0xb8   : > { %394 = vmatpush.bf16.msra.mxu0 %v360_v30  ;;  %407 = vmatpush.bf16.msra.mxu1 %v361_v31 }
  0xbb   : > { %613 = vmatmul.msk.bf16.vlgmr.msra.gmra.mxu0 %vm377_vm11, %v370_v32  ;;  %617 = vmatmul.msk.bf16.vlgmr.msra.gmra.mxu1 %vm377_vm11, %v370_v32 }
 0x138   : > { %v396_v34 = vpop.f32.mrf.mxu0  ;;  %v409_v35 = vpop.f32.mrf.mxu1 }
 0x139   : > { %v397_v36 = vadd.f32 %v396_v34, %v375_v33  ;;  %v410_v37 = vadd.f32 %v409_v35, %v375_v33 }
 0x13b   : > { %v413_v40 = vmax.f32 %v397_v36, 0.0  ;;  %v414_v41 = vmax.f32 %v410_v37, 0.0 }
 0x13d   : > { %455 = vrot.lane.b32.xlu1 %v413_v40, %s656_s28  ;;  %471 = vrot.lane.b32.xlu2 %v413_v40, %s657_s29 }
 0x13e   : > { %473 = vrot.lane.b32.xlu0 %v414_v41, %s657_s29 }
 0x140   : > { %v398_v42 = vpop.f32.mrf.mxu0  ;;  %v411_v43 = vpop.f32.mrf.mxu1 }
 0x145   : > { %465 = vrot.lane.b32.xlu1 %v414_v41, %s658_s30  ;;  %457 = vrot.lane.b32.xlu2 %v414_v41, %s656_s28 }
 0x146   : > { %463 = vrot.lane.b32.xlu0 %v413_v40, %s658_s30 }
 0x14d   : > { %431 = vrot.lane.b32.xlu1 %v413_v40, %s660_s8  ;;  %447 = vrot.lane.b32.xlu2 %v413_v40, %s659_s7 }
 0x14e   : > { %449 = vrot.lane.b32.xlu0 %v414_v41, %s659_s7 }
 0x155   : > { %441 = vrot.lane.b32.xlu1 %v414_v41, %s661_s9  ;;  %433 = vrot.lane.b32.xlu2 %v414_v41, %s660_s8 }
 0x156   : > { %439 = vrot.lane.b32.xlu0 %v413_v40, %s661_s9  ;;  %s253_s9 = scalar_lea.vmem %s963_s6, %s607_s24 }
 0x15d   : > { %423 = vrot.lane.b32.xlu1 %v413_v40, %s663_s11  ;;  %415 = vrot.lane.b32.xlu2 %v413_v40, %s662_s10 }
 0x15e   : > { %417 = vrot.lane.b32.xlu0 %v414_v41, %s662_s10 }
 0x165   : > { %425 = vrot.lane.b32.xlu2 %v414_v41, %s663_s11 }
 0x166   : > { %493 = vperm.xlu0 %641, %v490_v1  }
 0x197   : > { %v472_v44 = vpop.permute.xlu2 %471 }
 0x19f   : > { %v458_v45 = vpop.permute.xlu2 %457 }
 0x1a7   : > { %v448_v48 = vpop.permute.xlu2 %447 }
 0x1af   : > { %v456_v46 = vpop.permute.xlu1 %455  ;;  %v434_v6 = vpop.permute.xlu2 %433 }
 0x1b0   : > { %v474_v47 = vpop.permute.xlu0 %473  ;;  %v459_v61 = vsel %vm331_vm2, %v456_v46, %v458_v45  ;;  %v460_v62 = vsel %vm331_vm2, %v458_v45, %v456_v46 }
 0x1b1   : > { %v475_v49 = vsel %vm353_vm3, %v472_v44, %v474_v47  ;;  %v476_v50 = vsel %vm353_vm3, %v474_v47, %v472_v44  ;;  %v461_v2 = vmul.f32 %v459_v61, %v334_v17  ;;  %v462_v3 = vmul.f32 %v460_v62, %v335_v18 }
 0x1b2   : > { %v477_v51 = vmul.f32 %v759_v13, %v475_v49  ;;  %v478_v53 = vmul.f32 %v764_v14, %v476_v50 }
 0x1b4   : > { %v487_v57 = vpack.c.bf16 %v477_v51, %v477_v51  ;;  %v488_v58 = vpack.c.bf16 %v478_v53, %v478_v53 }
 0x1b6   : > { %v500_v59 = vsel %vm267_vm0, %v487_v57, 0  ;;  %v503_v60 = vsel %vm267_vm0, %v488_v58, 0 }
 0x1b7   : > { %508 = vmatpush.bf16.msra.mxu2 %v500_v59  ;;  %521 = vmatpush.bf16.msra.mxu3 %v503_v60  ;;  %v466_v63 = vpop.permute.xlu1 %465  ;;  %v416_v26 = vpop.permute.xlu2 %415 }
 0x1b8   : > { %v464_v0 = vpop.permute.xlu0 %463 }
 0x1b9   : > { %v467_v13 = vsel %vm342_vm1, %v464_v0, %v466_v63  ;;  %v468_v14 = vsel %vm342_vm1, %v466_v63, %v464_v0 }
 0x1ba   : > { %v469_v4 = vmul.f32 %v467_v13, %v345_v15  ;;  %v470_v5 = vmul.f32 %v468_v14, %v346_v16 }
 0x1bc   : > { %v485_v10 = vpack.c.bf16 %v469_v4, %v461_v2  ;;  %v486_v21 = vpack.c.bf16 %v470_v5, %v462_v3 }
 0x1be   : > { %509 = vmatpush.bf16.msra.mxu2 %v485_v10  ;;  %522 = vmatpush.bf16.msra.mxu3 %v486_v21 }
 0x1bf   : > { %v432_v22 = vpop.permute.xlu1 %431  ;;  %v426_v37 = vpop.permute.xlu2 %425 }
 0x1c0   : > { %v450_v23 = vpop.permute.xlu0 %449  ;;  %v435_v27 = vsel %vm298_vm8, %v432_v22, %v434_v6  ;;  %v436_v28 = vsel %vm298_vm8, %v434_v6, %v432_v22 }
 0x1c1   : > { %v451_v17 = vsel %vm320_vm4, %v448_v48, %v450_v23  ;;  %v452_v18 = vsel %vm320_vm4, %v450_v23, %v448_v48  ;;  %v438_v32 = vmul.f32 %v435_v27, %v302_v56 }
 0x1c2   : > { %v453_v15 = vmul.f32 %v451_v17, %v323_v38  ;;  %v454_v16 = vmul.f32 %v452_v18, %v324_v39  ;;  %v437_v39 = vmul.f32 %v436_v28, %v301_v55 }
 0x1c4   : > { %v483_v24 = vpack.c.bf16 %v453_v15, %v413_v40  ;;  %v484_v25 = vpack.c.bf16 %v454_v16, %v414_v41 }
 0x1c6   : > { %510 = vmatpush.bf16.msra.mxu2 %v483_v24  ;;  %523 = vmatpush.bf16.msra.mxu3 %v484_v25 }
 0x1c7   : > { %v442_v29 = vpop.permute.xlu1 %441 }
 0x1c8   : > { %v440_v30 = vpop.permute.xlu0 %439 }
 0x1c9   : > { %v443_v31 = vsel %vm309_vm7, %v440_v30, %v442_v29  ;;  %v444_v38 = vsel %vm309_vm7, %v442_v29, %v440_v30 }
 0x1ca   : > { %v445_v33 = vmul.f32 %v444_v38, %v312_v52  ;;  %v446_v34 = vmul.f32 %v443_v31, %v313_v54 }
 0x1cc   : > { %v481_v35 = vpack.c.bf16 %v445_v33, %v437_v39  ;;  %v482_v36 = vpack.c.bf16 %v446_v34, %v438_v32 }
 0x1ce   : > { %511 = vmatpush.bf16.msra.mxu2 %v481_v35  ;;  %524 = vmatpush.bf16.msra.mxu3 %v482_v36 }
 0x1cf   : > { %v424_v40 = vpop.permute.xlu1 %423 }
 0x1d0   : > { %v427_v41 = vsel %vm287_vm10, %v424_v40, %v426_v37  ;;  %v428_v55 = vsel %vm287_vm10, %v426_v37, %v424_v40  ;;  %v418_v42 = vpop.permute.xlu0 %417 }
 0x1d1   : > { %v429_v56 = vmul.f32 %v428_v55, %v290_v19  ;;  %v430_v52 = vmul.f32 %v427_v41, %v291_v20  ;;  %v419_v54 = vsel %vm276_vm9, %v416_v26, %v418_v42  ;;  %v420_v43 = vsel %vm276_vm9, %v418_v42, %v416_v26  ;;  %v489_v19 = vld [vmem:[%s959_s2] sm:$0x3] }
 0x1d2   : > { %v421_v44 = vmul.f32 %v420_v43, %v279_v7  ;;  %v422_v45 = vmul.f32 %v419_v54, %v280_v8 }
 0x1d4   : > { %v479_v46 = vpack.c.bf16 %v429_v56, %v421_v44  ;;  %v480_v47 = vpack.c.bf16 %v430_v52, %v422_v45 }
 0x1d6   : > { %512 = vmatpush.bf16.msra.mxu2 %v479_v46  ;;  %525 = vmatpush.bf16.msra.mxu3 %v480_v47 }
 0x1d8   : > { %v494_v9 = vpop.permute.xlu0 %493 }
 0x1d9   : > { %618 = vmatmul.msk.bf16.vlgmr.msra.gmra.mxu2 %vm377_vm11, %v489_v19  ;;  %619 = vmatmul.msk.bf16.vlgmr.msra.gmra.mxu3 %vm377_vm11, %v489_v19 }
 0x25c   : > { %v514_v20 = vpop.f32.mrf.mxu2  ;;  %v527_v11 = vpop.f32.mrf.mxu3 }
 0x25d   : > { %v515_v7 = vadd.f32 %v514_v20, %v494_v9  ;;  %v528_v48 = vadd.f32 %v527_v11, %v494_v9 }
 0x25f   : > { %v531_v12 = vmul.f32 0.5, %v515_v7  ;;  %v532_v8 = vmul.f32 0.5, %v528_v48 }
 0x261   : > { %644 = vtanh.f32 %v531_v12 }
 0x262   : > { %646 = vtanh.f32 %v532_v8 }
 0x264   : > { %v516_v49 = vpop.f32.mrf.mxu2  ;;  %v529_v50 = vpop.f32.mrf.mxu3 }
 0x267   : > { %v645_v51 = vpop.eup %644 }
 0x268   : > { %v647_v53 = vpop.eup %646  ;;  %v535_v57 = vmul.f32 0.5, %v645_v51 }
 0x269   : > { %v536_v58 = vmul.f32 0.5, %v647_v53 }
 0x26a   : > { %v537_v60 = vadd.f32 0.5, %v535_v57 }
 0x26b   : > { %v538_v59 = vadd.f32 0.5, %v536_v58 }
 0x26d   : > { %v541_v61 = vrot.slane %v538_v59, 4 }
 0x26f   : > { %v542_v62 = vsel %vm267_vm0, %v537_v60, %v541_v61 }
 0x270   : > { %544 = vst [vmem:[%s253_s9] sm:$0xff] %v542_v62 }
 0x271 PF: > { %s16_s21 = sadd.s32 1, %s654_s21  }
 0x272   : > { %p13_p4 = scmp.ge.s32.totalorder %s16_s21, 4  }
 0x274   :  { %15 = sbr.rel (!%p13_p4) target bundleno = 1 (0x1), region = 74 }

</bundles_post_ra>
